<compile_context>
chip_gen: v5e
topology: v5e:2x2
jax: 0.10.0
libtpu: 0.0.40
codegen_flags: <defaults>
</compile_context>

<pallas_src>
import math
from functools import partial

import jax
import jax.numpy as jnp
from jax import lax
from jax.experimental import pallas as pl
from jax.experimental.pallas import tpu as pltpu

MAX_VAL = 1e9

# ---- config mirroring the PyTorch module ----
D_MODEL = 32
N_HEADS = 4
D_K = D_MODEL // N_HEADS          # 8
GLOBAL_NUM = 2                    # args.bert_num_heads - args.local_num_heads
LOCAL_NUM = N_HEADS - GLOBAL_NUM  # 2
WINDOW = 2                        # args.init_val (local window size)
BATCH = 2
SEQ = 8                           # sequence length (<= max_len)


# -------------------- fully fused MHA kernel --------------------
def _mha_kernel(xq_ref, xk_ref, xv_ref, m_ref,
                wq_ref, bq_ref, wk_ref, bk_ref, wv_ref, bv_ref,
                wo_ref, bo_ref, o_ref,
                *, n_heads, d_k, global_num, window, batch, seq):
    # ---- input projections (everything is resident in VMEM) ----
    xq = xq_ref[...].astype(jnp.float32)          # (B*L, D)
    xk = xk_ref[...].astype(jnp.float32)
    xv = xv_ref[...].astype(jnp.float32)

    inv_scale = jnp.float32(1.0 / math.sqrt(d_k))
    # fold the 1/sqrt(d_k) score scaling into q once
    q = (jnp.dot(xq, wq_ref[...], preferred_element_type=jnp.float32)
         + bq_ref[...]) * inv_scale               # (B*L, D)
    k = jnp.dot(xk, wk_ref[...], preferred_element_type=jnp.float32) + bk_ref[...]
    v = jnp.dot(xv, wv_ref[...], preferred_element_type=jnp.float32) + bv_ref[...]

    # band mask for local heads (shape & window are static -> constant-foldable)
    row = lax.broadcasted_iota(jnp.int32, (seq, seq), 0)
    col = lax.broadcasted_iota(jnp.int32, (seq, seq), 1)
    band = jnp.abs(col - row) <= window           # (L, L) bool

    # ---- attention: static unroll over (batch, head) -> all 2-D ops ----
    ctx_rows = []                                 # per-batch (L, H*d_k) slabs
    for b in range(batch):
        rows = slice(b * seq, (b + 1) * seq)
        keep_g = m_ref[b] != 0                    # (L, L) key-padding mask
        keep_l = keep_g & band
        head_ctx = []
        for h in range(n_heads):
            cols = slice(h * d_k, (h + 1) * d_k)
            qh = q[rows, cols]                    # (L, d_k)
            kh = k[rows, cols]
            vh = v[rows, cols]

            s = jnp.dot(qh, kh.T, preferred_element_type=jnp.float32)   # (L, L)
            # static per-head choice: global heads skip the band mask entirely
            keep = keep_g if h < global_num else keep_l
            s = jnp.where(keep, s, jnp.float32(-MAX_VAL))

            s = s - jnp.max(s, axis=-1, keepdims=True)
            p = jnp.exp(s)
            # EUP reciprocal instead of a VPU divide
            inv_denom = pl.reciprocal(jnp.sum(p, axis=-1, keepdims=True),
                                      approx=True)
            # TODO(synk): dropout on attention weights is stochastic; eval-mode identity.
            ctx = jnp.dot(p, vh, preferred_element_type=jnp.float32) * inv_denom
            head_ctx.append(ctx)                  # (L, d_k)
        ctx_rows.append(jnp.concatenate(head_ctx, axis=-1))   # (L, D) lane-dense

    context = jnp.concatenate(ctx_rows, axis=0)   # (B*L, D) — no transpose needed

    # ---- output projection + single lane-dense store ----
    out = jnp.dot(context, wo_ref[...], preferred_element_type=jnp.float32) + bo_ref[...]
    o_ref[...] = out.astype(o_ref.dtype)


def multi_headed_attention(query, key, value, mask, params):
    B, L, D = query.shape
    xq = query.reshape(B * L, D)
    xk = key.reshape(B * L, D)
    xv = value.reshape(B * L, D)
    m = mask.reshape(B, L, L).astype(jnp.int32)   # (B,1,L,L) -> (B,L,L), DMA'd once

    kern = partial(_mha_kernel, n_heads=N_HEADS, d_k=D_K, global_num=GLOBAL_NUM,
                   window=WINDOW, batch=B, seq=L)
    vmem = pl.BlockSpec(memory_space=pltpu.MemorySpace.VMEM)
    out = pl.pallas_call(
        kern,
        out_shape=jax.ShapeDtypeStruct((B * L, D), query.dtype),
        in_specs=[vmem] * 12,
        out_specs=vmem,
    )(xq, xk, xv, m,
      params["wq"], params["bq"], params["wk"], params["bk"],
      params["wv"], params["bv"], params["wo"], params["bo"])
    return out.reshape(B, L, D)


# -------------------- pure-JAX reference (for sanity) --------------------
def reference(query, key, value, mask, params):
    B, L, D = query.shape
    H, d_k = N_HEADS, D_K

    def proj(x, w, b):
        y = x.reshape(B * L, D) @ w + b
        return y.reshape(B, L, H, d_k).transpose(0, 2, 1, 3)

    q = proj(query, params["wq"], params["bq"])
    k = proj(key, params["wk"], params["bk"])
    v = proj(value, params["wv"], params["bv"])
    scores = jnp.einsum("bhld,bhmd->bhlm", q, k) / math.sqrt(d_k)
    row = jnp.arange(L)[:, None]
    col = jnp.arange(L)[None, :]
    dist_ok = jnp.abs(col - row) <= WINDOW
    keep_g = mask != 0                                           # (B,1,L,L)
    keep_l = keep_g & dist_ok[None, None]
    head_is_global = (jnp.arange(H) < GLOBAL_NUM)[None, :, None, None]
    keep = jnp.where(head_is_global, keep_g, keep_l)
    scores = jnp.where(keep, scores, -MAX_VAL)
    p = jax.nn.softmax(scores, axis=-1)
    x = jnp.einsum("bhlm,bhmd->bhld", p, v)
    x = x.transpose(0, 2, 1, 3).reshape(B * L, D)
    return (x @ params["wo"] + params["bo"]).reshape(B, L, D)


def init_params(key):
    ks = jax.random.split(key, 8)
    bound = 1.0 / math.sqrt(D_MODEL)

    def lin(kw, kb):
        w = jax.random.uniform(kw, (D_MODEL, D_MODEL), jnp.float32, -bound, bound)
        b = jax.random.uniform(kb, (1, D_MODEL), jnp.float32, -bound, bound)
        return w, b

    wq, bq = lin(ks[0], ks[1])
    wk, bk = lin(ks[2], ks[3])
    wv, bv = lin(ks[4], ks[5])
    wo, bo = lin(ks[6], ks[7])
    return dict(wq=wq, bq=bq, wk=wk, bk=bk, wv=wv, bv=bv, wo=wo, bo=bo)


if __name__ == "__main__":
    root = jax.random.PRNGKey(0)
    kp, kq, kk, kv = jax.random.split(root, 4)
    params = init_params(kp)

    query = jax.random.normal(kq, (BATCH, SEQ, D_MODEL), jnp.float32)
    key_in = jax.random.normal(kk, (BATCH, SEQ, D_MODEL), jnp.float32)
    value = jax.random.normal(kv, (BATCH, SEQ, D_MODEL), jnp.float32)

    # key-padding mask: batch 0 attends to all 8 positions, batch 1 to first 5
    lengths = jnp.array([SEQ, 5], dtype=jnp.int32)
    mask = (jnp.arange(SEQ)[None, :] < lengths[:, None]).astype(jnp.int32)
    mask = jnp.broadcast_to(mask[:, None, None, :], (BATCH, 1, SEQ, SEQ))

    out = multi_headed_attention(query, key_in, value, mask, params)
    out = jax.block_until_ready(out)

    ref = reference(query, key_in, value, mask, params)
    # tolerance accommodates the EUP approximate reciprocal in the softmax denom
    assert jnp.allclose(out, ref, atol=2e-3, rtol=2e-3), "mismatch vs reference"

    print("KERNEL_OK")
</pallas_src>

<mosaic_0001>
module attributes {stable_mosaic.version = 11 : i64} {
  func.func @_mha_kernel(%arg0: memref<16x32xf32, #tpu.memory_space<vmem>>, %arg1: memref<16x32xf32, #tpu.memory_space<vmem>>, %arg2: memref<16x32xf32, #tpu.memory_space<vmem>>, %arg3: memref<2x8x8xi32, #tpu.memory_space<vmem>>, %arg4: memref<32x32xf32, #tpu.memory_space<vmem>>, %arg5: memref<1x32xf32, #tpu.memory_space<vmem>>, %arg6: memref<32x32xf32, #tpu.memory_space<vmem>>, %arg7: memref<1x32xf32, #tpu.memory_space<vmem>>, %arg8: memref<32x32xf32, #tpu.memory_space<vmem>>, %arg9: memref<1x32xf32, #tpu.memory_space<vmem>>, %arg10: memref<32x32xf32, #tpu.memory_space<vmem>>, %arg11: memref<1x32xf32, #tpu.memory_space<vmem>>, %arg12: memref<16x32xf32, #tpu.memory_space<vmem>>) attributes {dimension_semantics = [], scalar_prefetch = 0 : i64, scratch_operands = 0 : i64, tpu.core_type = #tpu.core_type<tc>} {
    %c0 = arith.constant 0 : index
    %c0_0 = arith.constant 0 : index
    %0 = vector.load %arg0[%c0, %c0_0] : memref<16x32xf32, #tpu.memory_space<vmem>>, vector<16x32xf32>
    %c0_1 = arith.constant 0 : index
    %c0_2 = arith.constant 0 : index
    %1 = vector.load %arg1[%c0_1, %c0_2] : memref<16x32xf32, #tpu.memory_space<vmem>>, vector<16x32xf32>
    %c0_3 = arith.constant 0 : index
    %c0_4 = arith.constant 0 : index
    %2 = vector.load %arg2[%c0_3, %c0_4] : memref<16x32xf32, #tpu.memory_space<vmem>>, vector<16x32xf32>
    %c0_5 = arith.constant 0 : index
    %c0_6 = arith.constant 0 : index
    %3 = vector.load %arg4[%c0_5, %c0_6] : memref<32x32xf32, #tpu.memory_space<vmem>>, vector<32x32xf32>
    %cst = arith.constant dense<0.000000e+00> : vector<16x32xf32>
    %4 = tpu.matmul %0, %3, %cst {dimension_numbers = #tpu.dot_dimension_numbers<[1], [0], [0], [1], [0, 0, 1, 1], [], []>} : vector<16x32xf32>, vector<32x32xf32>, vector<16x32xf32> -> vector<16x32xf32>
    %c0_7 = arith.constant 0 : index
    %c0_8 = arith.constant 0 : index
    %5 = vector.load %arg5[%c0_7, %c0_8] : memref<1x32xf32, #tpu.memory_space<vmem>>, vector<1x32xf32>
    %6 = vector.broadcast %5 : vector<1x32xf32> to vector<16x32xf32>
    %7 = arith.addf %4, %6 : vector<16x32xf32>
    %cst_9 = arith.constant 0.353553385 : f32
    %8 = vector.broadcast %cst_9 : f32 to vector<16x32xf32>
    %9 = arith.mulf %7, %8 : vector<16x32xf32>
    %c0_10 = arith.constant 0 : index
    %c0_11 = arith.constant 0 : index
    %10 = vector.load %arg6[%c0_10, %c0_11] : memref<32x32xf32, #tpu.memory_space<vmem>>, vector<32x32xf32>
    %cst_12 = arith.constant dense<0.000000e+00> : vector<16x32xf32>
    %11 = tpu.matmul %1, %10, %cst_12 {dimension_numbers = #tpu.dot_dimension_numbers<[1], [0], [0], [1], [0, 0, 1, 1], [], []>} : vector<16x32xf32>, vector<32x32xf32>, vector<16x32xf32> -> vector<16x32xf32>
    %c0_13 = arith.constant 0 : index
    %c0_14 = arith.constant 0 : index
    %12 = vector.load %arg7[%c0_13, %c0_14] : memref<1x32xf32, #tpu.memory_space<vmem>>, vector<1x32xf32>
    %13 = vector.broadcast %12 : vector<1x32xf32> to vector<16x32xf32>
    %14 = arith.addf %11, %13 : vector<16x32xf32>
    %c0_15 = arith.constant 0 : index
    %c0_16 = arith.constant 0 : index
    %15 = vector.load %arg8[%c0_15, %c0_16] : memref<32x32xf32, #tpu.memory_space<vmem>>, vector<32x32xf32>
    %cst_17 = arith.constant dense<0.000000e+00> : vector<16x32xf32>
    %16 = tpu.matmul %2, %15, %cst_17 {dimension_numbers = #tpu.dot_dimension_numbers<[1], [0], [0], [1], [0, 0, 1, 1], [], []>} : vector<16x32xf32>, vector<32x32xf32>, vector<16x32xf32> -> vector<16x32xf32>
    %c0_18 = arith.constant 0 : index
    %c0_19 = arith.constant 0 : index
    %17 = vector.load %arg9[%c0_18, %c0_19] : memref<1x32xf32, #tpu.memory_space<vmem>>, vector<1x32xf32>
    %18 = vector.broadcast %17 : vector<1x32xf32> to vector<16x32xf32>
    %19 = arith.addf %16, %18 : vector<16x32xf32>
    %20 = tpu.iota {dimensions = array<i32: 0>} : vector<8x8xi32>
    %21 = tpu.iota {dimensions = array<i32: 1>} : vector<8x8xi32>
    %22 = arith.subi %21, %20 : vector<8x8xi32>
    %23 = math.absi %22 : vector<8x8xi32>
    %c2_i32 = arith.constant 2 : i32
    %24 = vector.broadcast %c2_i32 : i32 to vector<8x8xi32>
    %25 = arith.cmpi sle, %23, %24 : vector<8x8xi32>
    %c0_20 = arith.constant 0 : index
    %c0_21 = arith.constant 0 : index
    %c0_22 = arith.constant 0 : index
    %26 = vector.load %arg3[%c0_20, %c0_21, %c0_22] : memref<2x8x8xi32, #tpu.memory_space<vmem>>, vector<1x8x8xi32>
    %27 = vector.shape_cast %26 : vector<1x8x8xi32> to vector<8x8xi32>
    %c0_i32 = arith.constant 0 : i32
    %28 = vector.broadcast %c0_i32 : i32 to vector<8x8xi32>
    %29 = arith.cmpi ne, %27, %28 : vector<8x8xi32>
    %30 = arith.andi %29, %25 : vector<8x8xi1>
    %31 = vector.extract_strided_slice %9 {offsets = [0, 0], sizes = [8, 8], strides = [1, 1]} : vector<16x32xf32> to vector<8x8xf32>
    %32 = vector.extract_strided_slice %14 {offsets = [0, 0], sizes = [8, 8], strides = [1, 1]} : vector<16x32xf32> to vector<8x8xf32>
    %33 = vector.extract_strided_slice %19 {offsets = [0, 0], sizes = [8, 8], strides = [1, 1]} : vector<16x32xf32> to vector<8x8xf32>
    %34 = tpu.transpose %32, [1, 0] : vector<8x8xf32> -> vector<8x8xf32>
    %cst_23 = arith.constant dense<0.000000e+00> : vector<8x8xf32>
    %35 = tpu.matmul %31, %34, %cst_23 {dimension_numbers = #tpu.dot_dimension_numbers<[1], [0], [0], [1], [0, 0, 1, 1], [], []>} : vector<8x8xf32>, vector<8x8xf32>, vector<8x8xf32> -> vector<8x8xf32>
    %cst_24 = arith.constant -1.000000e+09 : f32
    %36 = vector.broadcast %cst_24 : f32 to vector<8x8xf32>
    %37 = arith.select %29, %35, %36 : vector<8x8xi1>, vector<8x8xf32>
    %cst_25 = arith.constant dense<0xFF800000> : vector<8xf32>
    %38 = vector.multi_reduction <maximumf>, %37, %cst_25 [1] : vector<8x8xf32> to vector<8xf32>
    %39 = vector.shape_cast %38 : vector<8xf32> to vector<8x1xf32>
    %40 = vector.broadcast %39 : vector<8x1xf32> to vector<8x8xf32>
    %41 = arith.subf %37, %40 : vector<8x8xf32>
    %42 = math.exp %41 : vector<8x8xf32>
    %cst_26 = arith.constant dense<0.000000e+00> : vector<8xf32>
    %43 = vector.multi_reduction <add>, %42, %cst_26 [1] : vector<8x8xf32> to vector<8xf32>
    %44 = vector.shape_cast %43 : vector<8xf32> to vector<8x1xf32>
    %45 = tpu.reciprocal %44 {approx = true} : vector<8x1xf32> -> vector<8x1xf32>
    %cst_27 = arith.constant dense<0.000000e+00> : vector<8x8xf32>
    %46 = tpu.matmul %42, %33, %cst_27 {dimension_numbers = #tpu.dot_dimension_numbers<[1], [0], [0], [1], [0, 0, 1, 1], [], []>} : vector<8x8xf32>, vector<8x8xf32>, vector<8x8xf32> -> vector<8x8xf32>
    %47 = vector.broadcast %45 : vector<8x1xf32> to vector<8x8xf32>
    %48 = arith.mulf %46, %47 : vector<8x8xf32>
    %49 = vector.extract_strided_slice %9 {offsets = [0, 8], sizes = [8, 8], strides = [1, 1]} : vector<16x32xf32> to vector<8x8xf32>
    %50 = vector.extract_strided_slice %14 {offsets = [0, 8], sizes = [8, 8], strides = [1, 1]} : vector<16x32xf32> to vector<8x8xf32>
    %51 = vector.extract_strided_slice %19 {offsets = [0, 8], sizes = [8, 8], strides = [1, 1]} : vector<16x32xf32> to vector<8x8xf32>
    %52 = tpu.transpose %50, [1, 0] : vector<8x8xf32> -> vector<8x8xf32>
    %cst_28 = arith.constant dense<0.000000e+00> : vector<8x8xf32>
    %53 = tpu.matmul %49, %52, %cst_28 {dimension_numbers = #tpu.dot_dimension_numbers<[1], [0], [0], [1], [0, 0, 1, 1], [], []>} : vector<8x8xf32>, vector<8x8xf32>, vector<8x8xf32> -> vector<8x8xf32>
    %cst_29 = arith.constant -1.000000e+09 : f32
    %54 = vector.broadcast %cst_29 : f32 to vector<8x8xf32>
    %55 = arith.select %29, %53, %54 : vector<8x8xi1>, vector<8x8xf32>
    %cst_30 = arith.constant dense<0xFF800000> : vector<8xf32>
    %56 = vector.multi_reduction <maximumf>, %55, %cst_30 [1] : vector<8x8xf32> to vector<8xf32>
    %57 = vector.shape_cast %56 : vector<8xf32> to vector<8x1xf32>
    %58 = vector.broadcast %57 : vector<8x1xf32> to vector<8x8xf32>
    %59 = arith.subf %55, %58 : vector<8x8xf32>
    %60 = math.exp %59 : vector<8x8xf32>
    %cst_31 = arith.constant dense<0.000000e+00> : vector<8xf32>
    %61 = vector.multi_reduction <add>, %60, %cst_31 [1] : vector<8x8xf32> to vector<8xf32>
    %62 = vector.shape_cast %61 : vector<8xf32> to vector<8x1xf32>
    %63 = tpu.reciprocal %62 {approx = true} : vector<8x1xf32> -> vector<8x1xf32>
    %cst_32 = arith.constant dense<0.000000e+00> : vector<8x8xf32>
    %64 = tpu.matmul %60, %51, %cst_32 {dimension_numbers = #tpu.dot_dimension_numbers<[1], [0], [0], [1], [0, 0, 1, 1], [], []>} : vector<8x8xf32>, vector<8x8xf32>, vector<8x8xf32> -> vector<8x8xf32>
    %65 = vector.broadcast %63 : vector<8x1xf32> to vector<8x8xf32>
    %66 = arith.mulf %64, %65 : vector<8x8xf32>
    %67 = vector.extract_strided_slice %9 {offsets = [0, 16], sizes = [8, 8], strides = [1, 1]} : vector<16x32xf32> to vector<8x8xf32>
    %68 = vector.extract_strided_slice %14 {offsets = [0, 16], sizes = [8, 8], strides = [1, 1]} : vector<16x32xf32> to vector<8x8xf32>
    %69 = vector.extract_strided_slice %19 {offsets = [0, 16], sizes = [8, 8], strides = [1, 1]} : vector<16x32xf32> to vector<8x8xf32>
    %70 = tpu.transpose %68, [1, 0] : vector<8x8xf32> -> vector<8x8xf32>
    %cst_33 = arith.constant dense<0.000000e+00> : vector<8x8xf32>
    %71 = tpu.matmul %67, %70, %cst_33 {dimension_numbers = #tpu.dot_dimension_numbers<[1], [0], [0], [1], [0, 0, 1, 1], [], []>} : vector<8x8xf32>, vector<8x8xf32>, vector<8x8xf32> -> vector<8x8xf32>
    %cst_34 = arith.constant -1.000000e+09 : f32
    %72 = vector.broadcast %cst_34 : f32 to vector<8x8xf32>
    %73 = arith.select %30, %71, %72 : vector<8x8xi1>, vector<8x8xf32>
    %cst_35 = arith.constant dense<0xFF800000> : vector<8xf32>
    %74 = vector.multi_reduction <maximumf>, %73, %cst_35 [1] : vector<8x8xf32> to vector<8xf32>
    %75 = vector.shape_cast %74 : vector<8xf32> to vector<8x1xf32>
    %76 = vector.broadcast %75 : vector<8x1xf32> to vector<8x8xf32>
    %77 = arith.subf %73, %76 : vector<8x8xf32>
    %78 = math.exp %77 : vector<8x8xf32>
    %cst_36 = arith.constant dense<0.000000e+00> : vector<8xf32>
    %79 = vector.multi_reduction <add>, %78, %cst_36 [1] : vector<8x8xf32> to vector<8xf32>
    %80 = vector.shape_cast %79 : vector<8xf32> to vector<8x1xf32>
    %81 = tpu.reciprocal %80 {approx = true} : vector<8x1xf32> -> vector<8x1xf32>
    %cst_37 = arith.constant dense<0.000000e+00> : vector<8x8xf32>
    %82 = tpu.matmul %78, %69, %cst_37 {dimension_numbers = #tpu.dot_dimension_numbers<[1], [0], [0], [1], [0, 0, 1, 1], [], []>} : vector<8x8xf32>, vector<8x8xf32>, vector<8x8xf32> -> vector<8x8xf32>
    %83 = vector.broadcast %81 : vector<8x1xf32> to vector<8x8xf32>
    %84 = arith.mulf %82, %83 : vector<8x8xf32>
    %85 = vector.extract_strided_slice %9 {offsets = [0, 24], sizes = [8, 8], strides = [1, 1]} : vector<16x32xf32> to vector<8x8xf32>
    %86 = vector.extract_strided_slice %14 {offsets = [0, 24], sizes = [8, 8], strides = [1, 1]} : vector<16x32xf32> to vector<8x8xf32>
    %87 = vector.extract_strided_slice %19 {offsets = [0, 24], sizes = [8, 8], strides = [1, 1]} : vector<16x32xf32> to vector<8x8xf32>
    %88 = tpu.transpose %86, [1, 0] : vector<8x8xf32> -> vector<8x8xf32>
    %cst_38 = arith.constant dense<0.000000e+00> : vector<8x8xf32>
    %89 = tpu.matmul %85, %88, %cst_38 {dimension_numbers = #tpu.dot_dimension_numbers<[1], [0], [0], [1], [0, 0, 1, 1], [], []>} : vector<8x8xf32>, vector<8x8xf32>, vector<8x8xf32> -> vector<8x8xf32>
    %cst_39 = arith.constant -1.000000e+09 : f32
    %90 = vector.broadcast %cst_39 : f32 to vector<8x8xf32>
    %91 = arith.select %30, %89, %90 : vector<8x8xi1>, vector<8x8xf32>
    %cst_40 = arith.constant dense<0xFF800000> : vector<8xf32>
    %92 = vector.multi_reduction <maximumf>, %91, %cst_40 [1] : vector<8x8xf32> to vector<8xf32>
    %93 = vector.shape_cast %92 : vector<8xf32> to vector<8x1xf32>
    %94 = vector.broadcast %93 : vector<8x1xf32> to vector<8x8xf32>
    %95 = arith.subf %91, %94 : vector<8x8xf32>
    %96 = math.exp %95 : vector<8x8xf32>
    %cst_41 = arith.constant dense<0.000000e+00> : vector<8xf32>
    %97 = vector.multi_reduction <add>, %96, %cst_41 [1] : vector<8x8xf32> to vector<8xf32>
    %98 = vector.shape_cast %97 : vector<8xf32> to vector<8x1xf32>
    %99 = tpu.reciprocal %98 {approx = true} : vector<8x1xf32> -> vector<8x1xf32>
    %cst_42 = arith.constant dense<0.000000e+00> : vector<8x8xf32>
    %100 = tpu.matmul %96, %87, %cst_42 {dimension_numbers = #tpu.dot_dimension_numbers<[1], [0], [0], [1], [0, 0, 1, 1], [], []>} : vector<8x8xf32>, vector<8x8xf32>, vector<8x8xf32> -> vector<8x8xf32>
    %101 = vector.broadcast %99 : vector<8x1xf32> to vector<8x8xf32>
    %102 = arith.mulf %100, %101 : vector<8x8xf32>
    %103 = tpu.concatenate %48, %66, %84, %102 in 1 : vector<8x8xf32>, vector<8x8xf32>, vector<8x8xf32>, vector<8x8xf32> -> vector<8x32xf32>
    %c1 = arith.constant 1 : index
    %c0_43 = arith.constant 0 : index
    %c0_44 = arith.constant 0 : index
    %104 = vector.load %arg3[%c1, %c0_43, %c0_44] : memref<2x8x8xi32, #tpu.memory_space<vmem>>, vector<1x8x8xi32>
    %105 = vector.shape_cast %104 : vector<1x8x8xi32> to vector<8x8xi32>
    %c0_i32_45 = arith.constant 0 : i32
    %106 = vector.broadcast %c0_i32_45 : i32 to vector<8x8xi32>
    %107 = arith.cmpi ne, %105, %106 : vector<8x8xi32>
    %108 = arith.andi %107, %25 : vector<8x8xi1>
    %109 = vector.extract_strided_slice %9 {offsets = [8, 0], sizes = [8, 8], strides = [1, 1]} : vector<16x32xf32> to vector<8x8xf32>
    %110 = vector.extract_strided_slice %14 {offsets = [8, 0], sizes = [8, 8], strides = [1, 1]} : vector<16x32xf32> to vector<8x8xf32>
    %111 = vector.extract_strided_slice %19 {offsets = [8, 0], sizes = [8, 8], strides = [1, 1]} : vector<16x32xf32> to vector<8x8xf32>
    %112 = tpu.transpose %110, [1, 0] : vector<8x8xf32> -> vector<8x8xf32>
    %cst_46 = arith.constant dense<0.000000e+00> : vector<8x8xf32>
    %113 = tpu.matmul %109, %112, %cst_46 {dimension_numbers = #tpu.dot_dimension_numbers<[1], [0], [0], [1], [0, 0, 1, 1], [], []>} : vector<8x8xf32>, vector<8x8xf32>, vector<8x8xf32> -> vector<8x8xf32>
    %cst_47 = arith.constant -1.000000e+09 : f32
    %114 = vector.broadcast %cst_47 : f32 to vector<8x8xf32>
    %115 = arith.select %107, %113, %114 : vector<8x8xi1>, vector<8x8xf32>
    %cst_48 = arith.constant dense<0xFF800000> : vector<8xf32>
    %116 = vector.multi_reduction <maximumf>, %115, %cst_48 [1] : vector<8x8xf32> to vector<8xf32>
    %117 = vector.shape_cast %116 : vector<8xf32> to vector<8x1xf32>
    %118 = vector.broadcast %117 : vector<8x1xf32> to vector<8x8xf32>
    %119 = arith.subf %115, %118 : vector<8x8xf32>
    %120 = math.exp %119 : vector<8x8xf32>
    %cst_49 = arith.constant dense<0.000000e+00> : vector<8xf32>
    %121 = vector.multi_reduction <add>, %120, %cst_49 [1] : vector<8x8xf32> to vector<8xf32>
    %122 = vector.shape_cast %121 : vector<8xf32> to vector<8x1xf32>
    %123 = tpu.reciprocal %122 {approx = true} : vector<8x1xf32> -> vector<8x1xf32>
    %cst_50 = arith.constant dense<0.000000e+00> : vector<8x8xf32>
    %124 = tpu.matmul %120, %111, %cst_50 {dimension_numbers = #tpu.dot_dimension_numbers<[1], [0], [0], [1], [0, 0, 1, 1], [], []>} : vector<8x8xf32>, vector<8x8xf32>, vector<8x8xf32> -> vector<8x8xf32>
    %125 = vector.broadcast %123 : vector<8x1xf32> to vector<8x8xf32>
    %126 = arith.mulf %124, %125 : vector<8x8xf32>
    %127 = vector.extract_strided_slice %9 {offsets = [8, 8], sizes = [8, 8], strides = [1, 1]} : vector<16x32xf32> to vector<8x8xf32>
    %128 = vector.extract_strided_slice %14 {offsets = [8, 8], sizes = [8, 8], strides = [1, 1]} : vector<16x32xf32> to vector<8x8xf32>
    %129 = vector.extract_strided_slice %19 {offsets = [8, 8], sizes = [8, 8], strides = [1, 1]} : vector<16x32xf32> to vector<8x8xf32>
    %130 = tpu.transpose %128, [1, 0] : vector<8x8xf32> -> vector<8x8xf32>
    %cst_51 = arith.constant dense<0.000000e+00> : vector<8x8xf32>
    %131 = tpu.matmul %127, %130, %cst_51 {dimension_numbers = #tpu.dot_dimension_numbers<[1], [0], [0], [1], [0, 0, 1, 1], [], []>} : vector<8x8xf32>, vector<8x8xf32>, vector<8x8xf32> -> vector<8x8xf32>
    %cst_52 = arith.constant -1.000000e+09 : f32
    %132 = vector.broadcast %cst_52 : f32 to vector<8x8xf32>
    %133 = arith.select %107, %131, %132 : vector<8x8xi1>, vector<8x8xf32>
    %cst_53 = arith.constant dense<0xFF800000> : vector<8xf32>
    %134 = vector.multi_reduction <maximumf>, %133, %cst_53 [1] : vector<8x8xf32> to vector<8xf32>
    %135 = vector.shape_cast %134 : vector<8xf32> to vector<8x1xf32>
    %136 = vector.broadcast %135 : vector<8x1xf32> to vector<8x8xf32>
    %137 = arith.subf %133, %136 : vector<8x8xf32>
    %138 = math.exp %137 : vector<8x8xf32>
    %cst_54 = arith.constant dense<0.000000e+00> : vector<8xf32>
    %139 = vector.multi_reduction <add>, %138, %cst_54 [1] : vector<8x8xf32> to vector<8xf32>
    %140 = vector.shape_cast %139 : vector<8xf32> to vector<8x1xf32>
    %141 = tpu.reciprocal %140 {approx = true} : vector<8x1xf32> -> vector<8x1xf32>
    %cst_55 = arith.constant dense<0.000000e+00> : vector<8x8xf32>
    %142 = tpu.matmul %138, %129, %cst_55 {dimension_numbers = #tpu.dot_dimension_numbers<[1], [0], [0], [1], [0, 0, 1, 1], [], []>} : vector<8x8xf32>, vector<8x8xf32>, vector<8x8xf32> -> vector<8x8xf32>
    %143 = vector.broadcast %141 : vector<8x1xf32> to vector<8x8xf32>
    %144 = arith.mulf %142, %143 : vector<8x8xf32>
    %145 = vector.extract_strided_slice %9 {offsets = [8, 16], sizes = [8, 8], strides = [1, 1]} : vector<16x32xf32> to vector<8x8xf32>
    %146 = vector.extract_strided_slice %14 {offsets = [8, 16], sizes = [8, 8], strides = [1, 1]} : vector<16x32xf32> to vector<8x8xf32>
    %147 = vector.extract_strided_slice %19 {offsets = [8, 16], sizes = [8, 8], strides = [1, 1]} : vector<16x32xf32> to vector<8x8xf32>
    %148 = tpu.transpose %146, [1, 0] : vector<8x8xf32> -> vector<8x8xf32>
    %cst_56 = arith.constant dense<0.000000e+00> : vector<8x8xf32>
    %149 = tpu.matmul %145, %148, %cst_56 {dimension_numbers = #tpu.dot_dimension_numbers<[1], [0], [0], [1], [0, 0, 1, 1], [], []>} : vector<8x8xf32>, vector<8x8xf32>, vector<8x8xf32> -> vector<8x8xf32>
    %cst_57 = arith.constant -1.000000e+09 : f32
    %150 = vector.broadcast %cst_57 : f32 to vector<8x8xf32>
    %151 = arith.select %108, %149, %150 : vector<8x8xi1>, vector<8x8xf32>
    %cst_58 = arith.constant dense<0xFF800000> : vector<8xf32>
    %152 = vector.multi_reduction <maximumf>, %151, %cst_58 [1] : vector<8x8xf32> to vector<8xf32>
    %153 = vector.shape_cast %152 : vector<8xf32> to vector<8x1xf32>
    %154 = vector.broadcast %153 : vector<8x1xf32> to vector<8x8xf32>
    %155 = arith.subf %151, %154 : vector<8x8xf32>
    %156 = math.exp %155 : vector<8x8xf32>
    %cst_59 = arith.constant dense<0.000000e+00> : vector<8xf32>
    %157 = vector.multi_reduction <add>, %156, %cst_59 [1] : vector<8x8xf32> to vector<8xf32>
    %158 = vector.shape_cast %157 : vector<8xf32> to vector<8x1xf32>
    %159 = tpu.reciprocal %158 {approx = true} : vector<8x1xf32> -> vector<8x1xf32>
    %cst_60 = arith.constant dense<0.000000e+00> : vector<8x8xf32>
    %160 = tpu.matmul %156, %147, %cst_60 {dimension_numbers = #tpu.dot_dimension_numbers<[1], [0], [0], [1], [0, 0, 1, 1], [], []>} : vector<8x8xf32>, vector<8x8xf32>, vector<8x8xf32> -> vector<8x8xf32>
    %161 = vector.broadcast %159 : vector<8x1xf32> to vector<8x8xf32>
    %162 = arith.mulf %160, %161 : vector<8x8xf32>
    %163 = vector.extract_strided_slice %9 {offsets = [8, 24], sizes = [8, 8], strides = [1, 1]} : vector<16x32xf32> to vector<8x8xf32>
    %164 = vector.extract_strided_slice %14 {offsets = [8, 24], sizes = [8, 8], strides = [1, 1]} : vector<16x32xf32> to vector<8x8xf32>
    %165 = vector.extract_strided_slice %19 {offsets = [8, 24], sizes = [8, 8], strides = [1, 1]} : vector<16x32xf32> to vector<8x8xf32>
    %166 = tpu.transpose %164, [1, 0] : vector<8x8xf32> -> vector<8x8xf32>
    %cst_61 = arith.constant dense<0.000000e+00> : vector<8x8xf32>
    %167 = tpu.matmul %163, %166, %cst_61 {dimension_numbers = #tpu.dot_dimension_numbers<[1], [0], [0], [1], [0, 0, 1, 1], [], []>} : vector<8x8xf32>, vector<8x8xf32>, vector<8x8xf32> -> vector<8x8xf32>
    %cst_62 = arith.constant -1.000000e+09 : f32
    %168 = vector.broadcast %cst_62 : f32 to vector<8x8xf32>
    %169 = arith.select %108, %167, %168 : vector<8x8xi1>, vector<8x8xf32>
    %cst_63 = arith.constant dense<0xFF800000> : vector<8xf32>
    %170 = vector.multi_reduction <maximumf>, %169, %cst_63 [1] : vector<8x8xf32> to vector<8xf32>
    %171 = vector.shape_cast %170 : vector<8xf32> to vector<8x1xf32>
    %172 = vector.broadcast %171 : vector<8x1xf32> to vector<8x8xf32>
    %173 = arith.subf %169, %172 : vector<8x8xf32>
    %174 = math.exp %173 : vector<8x8xf32>
    %cst_64 = arith.constant dense<0.000000e+00> : vector<8xf32>
    %175 = vector.multi_reduction <add>, %174, %cst_64 [1] : vector<8x8xf32> to vector<8xf32>
    %176 = vector.shape_cast %175 : vector<8xf32> to vector<8x1xf32>
    %177 = tpu.reciprocal %176 {approx = true} : vector<8x1xf32> -> vector<8x1xf32>
    %cst_65 = arith.constant dense<0.000000e+00> : vector<8x8xf32>
    %178 = tpu.matmul %174, %165, %cst_65 {dimension_numbers = #tpu.dot_dimension_numbers<[1], [0], [0], [1], [0, 0, 1, 1], [], []>} : vector<8x8xf32>, vector<8x8xf32>, vector<8x8xf32> -> vector<8x8xf32>
    %179 = vector.broadcast %177 : vector<8x1xf32> to vector<8x8xf32>
    %180 = arith.mulf %178, %179 : vector<8x8xf32>
    %181 = tpu.concatenate %126, %144, %162, %180 in 1 : vector<8x8xf32>, vector<8x8xf32>, vector<8x8xf32>, vector<8x8xf32> -> vector<8x32xf32>
    %182 = tpu.concatenate %103, %181 in 0 : vector<8x32xf32>, vector<8x32xf32> -> vector<16x32xf32>
    %c0_66 = arith.constant 0 : index
    %c0_67 = arith.constant 0 : index
    %183 = vector.load %arg10[%c0_66, %c0_67] : memref<32x32xf32, #tpu.memory_space<vmem>>, vector<32x32xf32>
    %cst_68 = arith.constant dense<0.000000e+00> : vector<16x32xf32>
    %184 = tpu.matmul %182, %183, %cst_68 {dimension_numbers = #tpu.dot_dimension_numbers<[1], [0], [0], [1], [0, 0, 1, 1], [], []>} : vector<16x32xf32>, vector<32x32xf32>, vector<16x32xf32> -> vector<16x32xf32>
    %c0_69 = arith.constant 0 : index
    %c0_70 = arith.constant 0 : index
    %185 = vector.load %arg11[%c0_69, %c0_70] : memref<1x32xf32, #tpu.memory_space<vmem>>, vector<1x32xf32>
    %186 = vector.broadcast %185 : vector<1x32xf32> to vector<16x32xf32>
    %187 = arith.addf %184, %186 : vector<16x32xf32>
    %c0_71 = arith.constant 0 : index
    %c0_72 = arith.constant 0 : index
    %188 = vector.load %arg12[%c0_71, %c0_72] : memref<16x32xf32, #tpu.memory_space<vmem>>, vector<16x32xf32>
    tpu.vector_store %arg12[%c0_71, %c0_72], %187 {strides = array<i32>} : memref<16x32xf32, #tpu.memory_space<vmem>>, vector<16x32xf32>,
    return
  }
}

</mosaic_0001>

<bundles_post_ra>
// kernel: tpu_custom_call.1
= control target key start
LH: loop header
LB: loop body
LE: loop exit
PB: predicated region body
PF: predicated region fallthrough
CT: control target
= control target key end

     0   :  { %17 = vsyncpa [#allocation3], 0  ;;  %s1492_s0 = inlined_call_operand.hbm [shape: f32[16,32], index: 0, kind: input, shape index: {}]   ;;  %s1493_s1 = inlined_call_operand.hbm [shape: f32[16,32], index: 1, kind: input, shape index: {}]   ;;  %s1494_s2 = inlined_call_operand.hbm [shape: f32[16,32], index: 2, kind: input, shape index: {}]   ;;  %s1495_s3 = inlined_call_operand.hbm [shape: s32[2,8,8], index: 3, kind: input, shape index: {}]   ;;  %s1496_s4 = inlined_call_operand.hbm [shape: f32[32,32], index: 4, kind: input, shape index: {}]   ;;  %s1497_s5 = inlined_call_operand.vmem [shape: f32[1,32], index: 5, kind: input, shape index: {}]   ;;  %s1498_s6 = inlined_call_operand.hbm [shape: f32[32,32], index: 6, kind: input, shape index: {}]   ;;  %s1499_s7 = inlined_call_operand.vmem [shape: f32[1,32], index: 7, kind: input, shape index: {}]   ;;  %s1500_s8 = inlined_call_operand.hbm [shape: f32[32,32], index: 8, kind: input, shape index: {}]   ;;  %s1501_s9 = inlined_call_operand.vmem [shape: f32[1,32], index: 9, kind: input, shape index: {}]   ;;  %s1502_s10 = inlined_call_operand.hbm [shape: f32[32,32], index: 10, kind: input, shape index: {}]   ;;  %s1503_s11 = inlined_call_operand.vmem [shape: f32[1,32], index: 11, kind: input, shape index: {}]   ;;  %s1504_s12 = inlined_call_operand.hbm [shape: f32[16,32], index: 12, kind: output, shape index: {}]  }
   0x1   :  { %18 = vsyncpa [#allocation6], 0 }
   0x2   :  { %19 = vsyncpa [#allocation9], 0 }
   0x3   :  { %20 = vsyncpa [#allocation12], 0 }
   0x4   :  { %21 = vsyncpa [#allocation15], 0 }
   0x5   :  { %22 = vsyncpa [#allocation4], 0  ;;  %s40_s23 = sshll.u32 %s1493_s1, 4  ;;  %s1234_s24 = smov [#allocation5]   ;;  %s41_s23 = int_to_ptr.hbm [resolvable:$true] %s40_s23 }
   0x6   :  { %s42_s25 = sshll.u32 %s1234_s24, 4  ;;  %s66_s28 = sshll.u32 %s1495_s3, 4  ;;  %s43_s25 = int_to_ptr.vmem [resolvable:$true] %s42_s25  ;;  %s67_s28 = int_to_ptr.hbm [resolvable:$true] %s66_s28 }
   0x7   :  { %s1235_s29 = smov 128   ;;  %s1236_s30 = smov 8  }
   0x8   :  { %48 = dma.hbm_to_vmem [thread:$0]  %s41_s23, 256, %s43_s25, [#allocation6], %s1235_s29, %s1235_s29, %s1236_s30  }
   0x9   :  { %s1237_s13 = smov [#allocation8]   ;;  %s94_s1 = sshll.u32 %s1498_s6, 4  ;;  %s95_s1 = int_to_ptr.hbm [resolvable:$true] %s94_s1 }
   0xa   :  { %s68_s14 = sshll.u32 %s1237_s13, 4  ;;  %s27_s18 = sshll.u32 %s1492_s0, 4  ;;  %s69_s14 = int_to_ptr.vmem [resolvable:$true] %s68_s14  ;;  %s28_s18 = int_to_ptr.hbm [resolvable:$true] %s27_s18 }
   0xb   :  { %74 = dma.hbm_to_vmem [thread:$0]  %s67_s28, 256, %s69_s14, [#allocation9], %s1235_s29, %s1235_s29, %s1236_s30  }
   0xc   :  { %s1238_s19 = smov [#allocation11]   ;;  %s1239_s21 = smov [#allocation2]  }
   0xd   :  { %s96_s20 = sshll.u32 %s1238_s19, 4  ;;  %s29_s6 = sshll.u32 %s1239_s21, 4  ;;  %s97_s20 = int_to_ptr.vmem [resolvable:$true] %s96_s20  ;;  %s30_s6 = int_to_ptr.vmem [resolvable:$true] %s29_s6 }
   0xe   :  { %102 = dma.hbm_to_vmem [thread:$0]  %s95_s1, 512, %s97_s20, [#allocation12], %s1235_s29, %s1235_s29, %s1236_s30  }
   0xf   :  { %s53_s24 = sshll.u32 %s1494_s2, 4  ;;  %s79_s26 = sshll.u32 %s1496_s4, 4  ;;  %s54_s24 = int_to_ptr.hbm [resolvable:$true] %s53_s24  ;;  %s80_s26 = int_to_ptr.hbm [resolvable:$true] %s79_s26 }
  0x10   :  { %35 = dma.hbm_to_vmem [thread:$0]  %s28_s18, 256, %s30_s6, [#allocation3], %s1235_s29, %s1235_s29, %s1236_s30  }
  0x11   :  { %s1240_s27 = smov [#allocation7]   ;;  %s1241_s13 = smov [#allocation10]  }
  0x12   :  { %s55_s28 = sshll.u32 %s1240_s27, 4  ;;  %s81_s2 = sshll.u32 %s1241_s13, 4  ;;  %s56_s28 = int_to_ptr.vmem [resolvable:$true] %s55_s28  ;;  %s82_s2 = int_to_ptr.vmem [resolvable:$true] %s81_s2 }
  0x13   :  { %61 = dma.hbm_to_vmem [thread:$0]  %s54_s24, 256, %s56_s28, [#allocation6], %s1235_s29, %s1235_s29, %s1236_s30  }
  0x14   :  { %s109_s16 = sshll.u32 %s1500_s8, 4  ;;  %s124_s3 = sshll.u32 %s1502_s10, 4  ;;  %s110_s16 = int_to_ptr.hbm [resolvable:$true] %s109_s16  ;;  %s125_s3 = int_to_ptr.hbm [resolvable:$true] %s124_s3 }
  0x15   :  { %87 = dma.hbm_to_vmem [thread:$0]  %s80_s26, 512, %s82_s2, [#allocation9], %s1235_s29, %s1235_s29, %s1236_s30  }
  0x16   :  { %s1242_s17 = smov [#allocation13]   ;;  %s1243_s19 = smov [#allocation14]  }
  0x17   :  { %s111_s18 = sshll.u32 %s1242_s17, 4  ;;  %s126_s8 = sshll.u32 %s1243_s19, 4  ;;  %s112_s18 = int_to_ptr.vmem [resolvable:$true] %s111_s18  ;;  %s127_s8 = int_to_ptr.vmem [resolvable:$true] %s126_s8 }
  0x18   :  { %117 = dma.hbm_to_vmem [thread:$0]  %s110_s16, 512, %s112_s18, [#allocation12], %s1235_s29, %s1235_s29, %s1236_s30  }
  0x19   :  { %132 = dma.hbm_to_vmem [thread:$0]  %s125_s3, 512, %s127_s8, [#allocation15], %s1235_s29, %s1235_s29, %s1236_s30  }
  0x1a   :  { %1222 = dma.done.wait [#allocation3], 256  }
  0x1b   :  { %1223 = vsyncadd [#allocation3], 4294967040 }
  0x1c   :  { %1224 = dma.done.wait [#allocation6], 512  }
  0x1d   :  { %1225 = vsyncadd [#allocation6], 4294966784 }
  0x1e   :  { %1226 = dma.done.wait [#allocation9], 768  }
  0x1f   :  { %1227 = vsyncadd [#allocation9], 4294966528 }
  0x20   :  { %1228 = dma.done.wait [#allocation12], 1024  }
  0x21   :  { %1229 = vsyncadd [#allocation12], 4294966272 }
  0x22   :  { %1230 = dma.done.wait [#allocation15], 512  }
  0x23   :  { %1231 = vsyncadd [#allocation15], 4294966784  ;;  %v216_v0 = vld [vmem:[#allocation11 + $0x18] sm:$0xff]  ;;  %v215_v2 = vld [vmem:[#allocation11 + $0x10] sm:$0xff]  ;;  %vm181_vm0 = vcmask 261120   ;;  %vm299_vm1 = vcmask 64512   ;;  %v287_v43 = vlaneseq }
  0x24   :  { %v176_v1 = vld [vmem:[#allocation10 + $0x18] sm:$0xff]  ;;  %239 = vmatpush.msra.mxu1 %v216_v0  ;;  %v175_v3 = vld [vmem:[#allocation10 + $0x10] sm:$0xff]  ;;  %v214_v4 = vld [vmem:[#allocation11 + $0x8] sm:$0xff]  ;;  %950 = vmatpush.msra.mxu2 %v216_v0  ;;  %s1244_s22 = smov 104   ;;  %s1245_s23 = smov 112   ;;  %vm573_vm8 = vcmask 130048  }
  0x25   :  { %200 = vmatpush.msra.mxu0 %v176_v1  ;;  %v174_v5 = vld [vmem:[#allocation10 + $0x8] sm:$0xff]  ;;  %v213_v6 = vld [vmem:[#allocation11] sm:$0xff]  ;;  %v169_v8 = vld [vmem:[#allocation5] sm:$0xff]  ;;  %s1246_s24 = smov 120   ;;  %v288_v44 = vshrl.u32 %v287_v43, 7  ;;  %v290_v45 = vand.u32 127, %v287_v43 }
  0x26   :  { %240 = vmatpush.msra.mxu1 %v215_v2  ;;  %v173_v7 = vld [vmem:[#allocation10] sm:$0xff]  ;;  %951 = vmatpush.msra.mxu2 %v215_v2  ;;  %v170_v10 = vld [vmem:[#allocation5 + $0x8] sm:$0xff]  ;;  %v252_v12 = vld [vmem:[#allocation13 + $0x10] sm:$0xff]  ;;  %s1248_s0 = smov 24   ;;  %vm575_vm9 = vcmask 195584   ;;  %s1249_s27 = smov [#allocation16]  }
  0x27   :  { %201 = vmatpush.msra.mxu0 %v175_v3  ;;  %v167_v9 = vld [vmem:[#allocation2] sm:$0xff]  ;;  %v253_v11 = vld [vmem:[#allocation13 + $0x18] sm:$0xff]  ;;  %v251_v13 = vld [vmem:[#allocation13 + $0x8] sm:$0xff]  ;;  %v291_v48 = vsub.s32 %v290_v45, %v288_v44  ;;  %s899_s28 = sshll.u32 %s1249_s27, 4  ;;  %s901_s14 = sshll.u32 %s1504_s12, 4  ;;  %s900_s28 = int_to_ptr.vmem [resolvable:$true] %s899_s28  ;;  %s902_s14 = int_to_ptr.hbm [resolvable:$true] %s901_s14 }
  0x28   :  { %241 = vmatpush.msra.mxu1 %v214_v4  ;;  %952 = vmatpush.msra.mxu2 %v214_v4  ;;  %v168_v14 = vld [vmem:[#allocation2 + $0x8] sm:$0xff]  ;;  %v250_v15 = vld [vmem:[#allocation13] sm:$0xff]  ;;  %v1401_v36 = vld [vmem:[#allocation8] sm:$0xff] }
  0x29   :  { %202 = vmatpush.msra.mxu0 %v174_v5  ;;  %v171_v16 = vld [vmem:[#allocation7] sm:$0xff]  ;;  %vm297_vm2 = vcmp.ne.s32.totalorder %v1401_v36, 0  ;;  %v172_v47 = vld [vmem:[#allocation7 + $0x8] sm:$0xff]  ;;  %v293_v49 = vsub.s32 0, %v291_v48  ;;  %vm292_vm3 = vcmp.lt.s32.totalorder %v291_v48, 0  ;;  %v578_v57 = vld [vmem:[#allocation8 + $0x8] sm:$0xff] }
  0x2a   :  { %242 = vmatpush.msra.mxu1 %v213_v6  ;;  %953 = vmatpush.msra.mxu2 %v213_v6  ;;  %v970_v17 = vld [vmem:[%s1499_s7] ss:$0 sm:$0xff]  ;;  %vm579_vm6 = vcmp.ne.s32.totalorder %v578_v57, 0 }
  0x2b   :  { %203 = vmatpush.msra.mxu0 %v173_v7  ;;  %920 = vmatmul.msk.f32.vlgmr.msra.gmra.mxu1 %vm181_vm0, %v169_v8  ;;  %v971_v18 = vld [vmem:[%s1497_s5] ss:$0 sm:$0xff]  ;;  %v294_v51 = vsel %vm292_vm3, %v293_v49, %v291_v48 }
  0x2c   :  { %918 = vmatmul.msk.f32.vlgmr.msra.gmra.mxu0 %vm181_vm0, %v167_v9  ;;  %921 = vmatmul.msk.f32.vlgmr.msra.gmra.mxu2 %vm181_vm0, %v170_v10  ;;  %v1386_v26 = vld [vmem:[%s1501_s9] ss:$0 sm:$0xff]  ;;  %vm295_vm4 = vcmp.le.s32.totalorder %v294_v51, 2  ;;  %s1247_s9 = smov 16  }
  0x2d   :  { %276 = vmatpush.msrb.mxu2 %v253_v11  ;;  %vm1413_vm5 = vmand %vm297_vm2, %vm295_vm4 }
  0x2e   :  { %vm580_vm7 = vmand %vm579_vm6, %vm295_vm4 }
  0x2f   :  { %277 = vmatpush.msrb.mxu2 %v252_v12 }
  0x31   :  { %278 = vmatpush.msrb.mxu2 %v251_v13 }
  0x33   :  { %279 = vmatpush.msrb.mxu2 %v250_v15 }
  0x34   :  { %919 = vmatmul.msk.f32.gmra.mxu0 %vm181_vm0, %v168_v14  ;;  %922 = vmatmul.msk.f32.vlgmr.msrb.gmra.mxu2 %vm181_vm0, %v171_v16 }
  0x3c   :  { %923 = vmatmul.msk.f32.gmra.mxu2 %vm181_vm0, %v172_v47 }
  0xa8   :  { %v244_v19 = vpop.f32.mrf.mxu1 }
  0xa9   :  { %v205_v20 = vpop.f32.mrf.mxu0  ;;  %v245_v21 = vadd.f32 %v970_v17, %v244_v19 }
  0xaa   :  { %v206_v22 = vadd.f32 %v971_v18, %v205_v20 }
  0xab   :  { %496 = vrot.lane.b32.xlu2 %v245_v21, %s1244_s22  ;;  %430 = vrot.lane.b32.xlu1 %v245_v21, %s1245_s23 }
  0xac   :  { %v211_v23 = vmul.f32 0.35355338, %v206_v22  ;;  %363 = vrot.lane.b32.xlu0 %v245_v21, %s1246_s24  ;;  %924 = vmatpush.xpose.msk.msra.mxu3 %vm299_vm1, %v245_v21 }
  0xaf   :  { %925 = vmatmul.msk.f32.vlgmr.msra.gmra.mxu3 %vm299_vm1, %v211_v23  ;;  %v247_v24 = vpop.f32.mrf.mxu2 }
  0xb0   :  { %v248_v25 = vadd.f32 %v970_v17, %v247_v24 }
  0xb1   :  { %v208_v29 = vpop.f32.mrf.mxu0 }
  0xb2   :  { %v209_v30 = vadd.f32 %v971_v18, %v208_v29 }
  0xb3   :  { %428 = vrot.lane.b32.xlu2 %v211_v23, %s1245_s23  ;;  %361 = vrot.lane.b32.xlu1 %v211_v23, %s1246_s24 }
  0xb4   :  { %v212_v31 = vmul.f32 0.35355338, %v209_v30 }
  0xb7   :  { %v281_v27 = vpop.f32.mrf.mxu2 }
  0xb8   :  { %v1389_v28 = vadd.f32 %v1386_v26, %v281_v27 }
  0xba   :  { %355 = vmatpush.msrb.mxu3 %v1389_v28 }
  0xbb   :  { %494 = vrot.lane.b32.xlu1 %v211_v23, %s1244_s22  ;;  %644 = vrot.lane.b32.xlu2 %v248_v25, %s1246_s24 }
  0xbf   :  { %v284_v3 = vpop.f32.mrf.mxu2 }
  0xc0   :  { %v285_v4 = vadd.f32 %v1386_v26, %v284_v3 }
  0xc3   :  { %711 = vrot.lane.b32.xlu2 %v248_v25, %s1245_s23  ;;  %642 = vrot.lane.b32.xlu1 %v212_v31, %s1246_s24 }
  0xcb   :  { %775 = vrot.lane.b32.xlu2 %v212_v31, %s1244_s22  ;;  %709 = vrot.lane.b32.xlu1 %v212_v31, %s1245_s23 }
 0x105   :  { %v497_v32 = vpop.permute.xlu2 %496 }
 0x10d   :  { %v429_v35 = vpop.permute.xlu2 %428 }
 0x115   :  { %v645_v40 = vpop.permute.xlu2 %644 }
 0x11d   :  { %v431_v33 = vpop.permute.xlu1 %430  ;;  %v712_v41 = vpop.permute.xlu2 %711 }
 0x11e   :  { %v364_v34 = vpop.permute.xlu0 %363  ;;  %930 = vmatpush.xpose.msk.msrb.mxu1 %vm299_vm1, %v431_v33 }
 0x11f   :  { %927 = vmatpush.xpose.msk.msra.mxu3 %vm299_vm1, %v364_v34 }
 0x121   :  { %931 = vmatmul.msk.f32.vlgmr.msrb.gmra.mxu1 %vm299_vm1, %v429_v35 }
 0x122   :  { %936 = vmatpush.xpose.msk.msra.mxu1 %vm299_vm1, %v248_v25 }
 0x125   :  { %v362_v42 = vpop.permute.xlu1 %361  ;;  %v776_v2 = vpop.permute.xlu2 %775 }
 0x126   :  { %942 = vmatpush.xpose.msk.msrb.mxu1 %vm299_vm1, %v712_v41 }
 0x129   :  { %937 = vmatmul.msk.f32.vlgmr.msra.gmra.mxu1 %vm299_vm1, %v212_v31 }
 0x12d   :  { %v495_v46 = vpop.permute.xlu1 %494 }
 0x132   :  { %v323_v37 = vpop.f32.mrf.mxu3 }
 0x133   :  { %v326_v38 = vsel %vm297_vm2, %v323_v37, -1e+09 }
 0x134   :  { %v327_v39 = vsel %vm299_vm1, %v326_v38, -inf }
 0x135   :  { %328 = vmax.xlane.f32.xlu0 %v327_v39  ;;  %v643_v50 = vpop.permute.xlu1 %642 }
 0x13d   :  { %v710_v53 = vpop.permute.xlu1 %709 }
 0x13e   :  { %943 = vmatmul.msk.f32.vlgmr.msrb.gmra.mxu1 %vm299_vm1, %v710_v53 }
 0x149   :  { %777 = vrot.lane.b32.xlu0 %v248_v25, %s1244_s22 }
 0x19e   :  { %v453_v54 = vpop.f32.mrf.mxu1 }
 0x19f   :  { %v456_v55 = vsel %vm1413_vm5, %v453_v54, -1e+09 }
 0x1a0   :  { %v457_v56 = vsel %vm299_vm1, %v456_v55, -inf }
 0x1a1   :  { %458 = vmax.xlane.f32.xlu1 %v457_v56 }
 0x1a6   :  { %v604_v58 = vpop.f32.mrf.mxu1 }
 0x1a7   :  { %v607_v59 = vsel %vm579_vm6, %v604_v58, -1e+09 }
 0x1a8   :  { %v329_v60 = vpop.xlane.xlu0 %328  ;;  %v608_v61 = vsel %vm299_vm1, %v607_v59, -inf }
 0x1a9   :  { %v330_v62 = vsub.f32 %v326_v38, %v329_v60  ;;  %609 = vmax.xlane.f32.xlu0 %v608_v61 }
 0x1ab   :  { %v331_v63 = vmul.f32 1.442695, %v330_v62 }
 0x1ad   :  { %974 = vpow2.f32 %v331_v63 }
 0x1b3   :  { %v1423_v0 = vpop.eup %974 }
 0x1b4   :  { %926 = vmatmul.msk.f32.vlgmr.msrb.gmra.mxu3 %vm299_vm1, %v1423_v0  ;;  %v333_v62 = vsel %vm299_vm1, %v1423_v0, 0.0 }
 0x1b5   :  { %933 = vmatpush.xpose.msk.msrb.mxu3 %vm299_vm1, %v497_v32 }
 0x1ba   :  { %467 = vrot.lane.b32.xlu1 %v1389_v28, %s1245_s23 }
 0x1bb   :  { %v778_v1 = vpop.permute.xlu0 %777  ;;  %v734_v18 = vpop.f32.mrf.mxu1 }
 0x1bc   :  { %928 = vmatmul.msk.f32.vlgmr.msra.gmra.mxu3 %vm299_vm1, %v362_v42  ;;  %v737_v19 = vsel %vm580_vm7, %v734_v18, -1e+09 }
 0x1bd   :  { %939 = vmatpush.xpose.msk.msra.mxu3 %vm299_vm1, %v645_v40  ;;  %v738_v23 = vsel %vm299_vm1, %v737_v19, -inf }
 0x1c2   :  { %682 = vrot.lane.b32.xlu1 %v285_v4, %s1246_s24 }
 0x1c4   :  { %934 = vmatmul.msk.f32.vlgmr.msrb.gmra.mxu3 %vm299_vm1, %v495_v46 }
 0x1c5   :  { %945 = vmatpush.xpose.msk.msrb.mxu3 %vm299_vm1, %v778_v1 }
 0x1ca   :  { %748 = vrot.lane.b32.xlu1 %v285_v4, %s1245_s23 }
 0x1cc   :  { %940 = vmatmul.msk.f32.vlgmr.msra.gmra.mxu3 %vm299_vm1, %v643_v50 }
 0x1d4   :  { %946 = vmatmul.msk.f32.vlgmr.msrb.gmra.mxu3 %vm299_vm1, %v776_v2 }
 0x214   :  { %v459_v5 = vpop.xlane.xlu1 %458 }
 0x215   :  { %v460_v6 = vsub.f32 %v456_v55, %v459_v5 }
 0x217   :  { %v461_v7 = vmul.f32 1.442695, %v460_v6 }
 0x219   :  { %976 = vpow2.f32 %v461_v7 }
 0x21c   :  { %v610_v8 = vpop.xlane.xlu0 %609 }
 0x21d   :  { %v611_v9 = vsub.f32 %v607_v59, %v610_v8 }
 0x21f   :  { %v612_v10 = vmul.f32 1.442695, %v611_v9  ;;  %v977_v12 = vpop.eup %976 }
 0x220   :  { %v463_v44 = vsel %vm299_vm1, %v977_v12, 0.0 }
 0x221   :  { %978 = vpow2.f32 %v612_v10 }
 0x227   :  { %v979_v13 = vpop.eup %978 }
 0x228   :  { %v614_v47 = vsel %vm299_vm1, %v979_v13, 0.0 }
 0x22c   :  { %v468_v11 = vpop.permute.xlu1 %467 }
 0x22d   :  { %488 = vmatpush.msra.mxu2 %v468_v11 }
 0x22e   :  { %932 = vmatmul.msk.f32.vlgmr.msra.gmra.mxu2 %vm299_vm1, %v977_v12 }
 0x22f   :  { %636 = vmatpush.msrb.mxu2 %v285_v4 }
 0x234   :  { %v683_v31 = vpop.permute.xlu1 %682 }
 0x236   :  { %938 = vmatmul.msk.f32.vlgmr.msrb.gmra.mxu2 %vm299_vm1, %v979_v13 }
 0x237   :  { %v1441_v14 = vpop.f32.mrf.mxu3 }
 0x23c   :  { %v749_v32 = vpop.permute.xlu1 %748 }
 0x23d   :  { %769 = vmatpush.msra.mxu2 %v749_v32 }
 0x23f   :  { %v386_v15 = vpop.f32.mrf.mxu3 }
 0x240   :  { %v389_v16 = vsel %vm297_vm2, %v386_v15, -1e+09 }
 0x241   :  { %v390_v17 = vsel %vm299_vm1, %v389_v16, -inf }
 0x242   :  { %391 = vmax.xlane.f32.xlu0 %v390_v17 }
 0x247   :  { %v519_v20 = vpop.f32.mrf.mxu3 }
 0x248   :  { %v522_v21 = vsel %vm1413_vm5, %v519_v20, -1e+09 }
 0x249   :  { %v523_v22 = vsel %vm299_vm1, %v522_v21, -inf }
 0x24a   :  { %524 = vmax.xlane.f32.xlu2 %v523_v22  ;;  %739 = vmax.xlane.f32.xlu0 %v738_v23 }
 0x24f   :  { %v667_v24 = vpop.f32.mrf.mxu3 }
 0x250   :  { %v670_v25 = vsel %vm579_vm6, %v667_v24, -1e+09 }
 0x251   :  { %v671_v29 = vsel %vm299_vm1, %v670_v25, -inf }
 0x257   :  { %v800_v26 = vpop.f32.mrf.mxu3 }
 0x258   :  { %v803_v27 = vsel %vm580_vm7, %v800_v26, -1e+09  ;;  %v858_v26 = vld [vmem:[#allocation14 + $0x10] sm:$0xff] }
 0x259   :  { %v804_v30 = vsel %vm299_vm1, %v803_v27, -inf }
 0x25e   :  { %533 = vrot.lane.b32.xlu0 %v1389_v28, %s1244_s22 }
 0x262   :  { %401 = vrot.lane.b32.xlu2 %v1389_v28, %s1246_s24 }
 0x288   :  { %672 = vmax.xlane.f32.xlu0 %v671_v29  ;;  %v856_v29 = vld [vmem:[#allocation14] sm:$0xff] }
 0x28b   :  { %805 = vmax.xlane.f32.xlu2 %v804_v30 }
 0x29c   :  { %814 = vrot.lane.b32.xlu0 %v285_v4, %s1244_s22 }
 0x2b1   :  { %v490_v4 = vpop.f32.mrf.mxu2 }
 0x2b5   :  { %v392_v33 = vpop.xlane.xlu0 %391 }
 0x2b6   :  { %v393_v34 = vsub.f32 %v389_v16, %v392_v33 }
 0x2b8   :  { %v394_v35 = vmul.f32 1.442695, %v393_v34 }
 0x2b9   :  { %v638_v0 = vpop.f32.mrf.mxu2 }
 0x2ba   :  { %980 = vpow2.f32 %v394_v35 }
 0x2bd   :  { %v525_v28 = vpop.xlane.xlu2 %524  ;;  %v740_v36 = vpop.xlane.xlu0 %739 }
 0x2be   :  { %v741_v37 = vsub.f32 %v737_v19, %v740_v36  ;;  %v526_v40 = vsub.f32 %v522_v21, %v525_v28 }
 0x2c0   :  { %v981_v38 = vpop.eup %980  ;;  %v742_v39 = vmul.f32 1.442695, %v741_v37  ;;  %v527_v42 = vmul.f32 1.442695, %v526_v40 }
 0x2c1   :  { %v396_v41 = vsel %vm299_vm1, %v981_v38, 0.0 }
 0x2c2   :  { %397 = vadd.xlane.f32.xlu1 %v396_v41  ;;  %982 = vpow2.f32 %v742_v39 }
 0x2c3   :  { %984 = vpow2.f32 %v527_v42 }
 0x2c5   :  { %v402_v43 = vpop.permute.xlu2 %401 }
 0x2c6   :  { %422 = vmatpush.msrb.mxu0 %v402_v43  ;;  %464 = vadd.xlane.f32.xlu0 %v463_v44 }
 0x2c7   :  { %929 = vmatmul.msk.f32.vlgmr.msrb.gmra.mxu0 %vm299_vm1, %v981_v38 }
 0x2c8   :  { %v983_v45 = vpop.eup %982 }
 0x2c9   :  { %944 = vmatmul.msk.f32.vlgmr.msra.gmra.mxu2 %vm299_vm1, %v983_v45  ;;  %v744_v46 = vsel %vm299_vm1, %v983_v45, 0.0  ;;  %v985_v48 = vpop.eup %984 }
 0x2ca   :  { %745 = vadd.xlane.f32.xlu2 %v744_v46  ;;  %v529_v50 = vsel %vm299_vm1, %v985_v48, 0.0  ;;  %v973_v46 = vld [vmem:[%s1503_s11] ss:$0 sm:$0xff] }
 0x2ce   :  { %615 = vadd.xlane.f32.xlu0 %v614_v47 }
 0x2d0   :  { %v534_v49 = vpop.permute.xlu0 %533 }
 0x2d1   :  { %554 = vmatpush.msra.mxu0 %v534_v49 }
 0x2d2   :  { %935 = vmatmul.msk.f32.vlgmr.msra.gmra.mxu0 %vm299_vm1, %v985_v48  ;;  %530 = vadd.xlane.f32.xlu2 %v529_v50 }
 0x2d3   :  { %703 = vmatpush.msrb.mxu0 %v683_v31 }
 0x2fb   :  { %v673_v51 = vpop.xlane.xlu0 %672 }
 0x2fc   :  { %v674_v52 = vsub.f32 %v670_v25, %v673_v51  ;;  %v859_v25 = vld [vmem:[#allocation14 + $0x18] sm:$0xff] }
 0x2fd   :  { %882 = vmatpush.msra.mxu1 %v859_v25 }
 0x2fe   :  { %v675_v53 = vmul.f32 1.442695, %v674_v52  ;;  %v806_v54 = vpop.xlane.xlu2 %805 }
 0x2ff   :  { %v807_v55 = vsub.f32 %v803_v27, %v806_v54  ;;  %v857_v27 = vld [vmem:[#allocation14 + $0x8] sm:$0xff]  ;;  %883 = vmatpush.msra.mxu1 %v858_v26 }
 0x300   :  { %986 = vpow2.f32 %v675_v53 }
 0x301   :  { %v808_v56 = vmul.f32 1.442695, %v807_v55  ;;  %884 = vmatpush.msra.mxu1 %v857_v27 }
 0x303   :  { %988 = vpow2.f32 %v808_v56  ;;  %885 = vmatpush.msra.mxu1 %v856_v29 }
 0x306   :  { %v987_v57 = vpop.eup %986 }
 0x307   :  { %941 = vmatmul.msk.f32.vlgmr.msrb.gmra.mxu0 %vm299_vm1, %v987_v57  ;;  %v677_v58 = vsel %vm299_vm1, %v987_v57, 0.0 }
 0x308   :  { %678 = vadd.xlane.f32.xlu2 %v677_v58 }
 0x309   :  { %v989_v59 = vpop.eup %988 }
 0x30a   :  { %v810_v60 = vsel %vm299_vm1, %v989_v59, 0.0 }
 0x30b   :  { %811 = vadd.xlane.f32.xlu1 %v810_v60 }
 0x30e   :  { %v815_v61 = vpop.permute.xlu0 %814 }
 0x30f   :  { %835 = vmatpush.msra.mxu0 %v815_v61 }
 0x310   :  { %334 = vadd.xlane.f32.xlu2 %v333_v62  ;;  %947 = vmatmul.msk.f32.vlgmr.msra.gmra.mxu0 %vm299_vm1, %v989_v59 }
 0x335   :  { %v398_v1 = vpop.xlane.xlu1 %397 }
 0x339   :  { %v465_v63 = vpop.xlane.xlu0 %464 }
 0x33a   :  { %990 = vrcp.f32 %v465_v63 }
 0x33b   :  { %992 = vrcp.f32 %v398_v1 }
 0x33d   :  { %v746_v2 = vpop.xlane.xlu2 %745 }
 0x340   :  { %v991_v3 = vpop.eup %990 }
 0x341   :  { %v493_v5 = vmul.f32 %v991_v3, %v490_v4  ;;  %v993_v6 = vpop.eup %992  ;;  %v616_v32 = vpop.xlane.xlu0 %615 }
 0x343   :  { %565 = vrot.lane.b32.xlu2 %v493_v5, %s1247_s9 }
 0x344   :  { %v424_v7 = vpop.f32.mrf.mxu0 }
 0x345   :  { %v427_v8 = vmul.f32 %v993_v6, %v424_v7  ;;  %v531_v9 = vpop.xlane.xlu2 %530 }
 0x346   :  { %994 = vrcp.f32 %v531_v9 }
 0x347   :  { %561 = vrot.lane.b32.xlu1 %v427_v8, %s1236_s30  ;;  %996 = vrcp.f32 %v746_v2 }
 0x34c   :  { %v995_v10 = vpop.eup %994  ;;  %v771_v13 = vpop.f32.mrf.mxu2 }
 0x34d   :  { %v997_v15 = vpop.eup %996 }
 0x34e   :  { %v774_v16 = vmul.f32 %v997_v15, %v771_v13 }
 0x34f   :  { %v556_v11 = vpop.f32.mrf.mxu0 }
 0x350   :  { %v559_v12 = vmul.f32 %v995_v10, %v556_v11 }
 0x352   :  { %569 = vrot.lane.b32.xlu0 %v559_v12, %s1248_s0 }
 0x35a   :  { %846 = vrot.lane.b32.xlu0 %v774_v16, %s1247_s9 }
 0x37b   :  { %v679_v17 = vpop.xlane.xlu2 %678 }
 0x37c   :  { %998 = vrcp.f32 %v679_v17 }
 0x37e   :  { %v812_v19 = vpop.xlane.xlu1 %811 }
 0x37f   :  { %1000 = vrcp.f32 %v812_v19 }
 0x382   :  { %v999_v18 = vpop.eup %998 }
 0x383   :  { %v335_v30 = vpop.xlane.xlu2 %334 }
 0x384   :  { %v705_v20 = vpop.f32.mrf.mxu0  ;;  %1002 = vrcp.f32 %v335_v30 }
 0x385   :  { %v708_v21 = vmul.f32 %v999_v18, %v705_v20  ;;  %v1001_v22 = vpop.eup %1000  ;;  %1004 = vrcp.f32 %v616_v32 }
 0x387   :  { %842 = vrot.lane.b32.xlu1 %v708_v21, %s1236_s30 }
 0x38a   :  { %v1003_v31 = vpop.eup %1002 }
 0x38b   :  { %v360_v34 = vmul.f32 %v1003_v31, %v1441_v14  ;;  %v1005_v39 = vpop.eup %1004 }
 0x38c   :  { %v641_v40 = vmul.f32 %v1005_v39, %v638_v0 }
 0x38d   :  { %v837_v23 = vpop.f32.mrf.mxu0 }
 0x38e   :  { %v840_v24 = vmul.f32 %v1001_v22, %v837_v23 }
 0x390   :  { %850 = vrot.lane.b32.xlu2 %v840_v24, %s1248_s0 }
 0x39d   :  { %v566_v28 = vpop.permute.xlu2 %565 }
 0x3b9   :  { %v562_v33 = vpop.permute.xlu1 %561 }
 0x3ba   :  { %v572_v35 = vsel %vm299_vm1, %v360_v34, %v562_v33 }
 0x3bb   :  { %v574_v36 = vsel %vm573_vm8, %v572_v35, %v566_v28 }
 0x3c4   :  { %v570_v37 = vpop.permute.xlu0 %569 }
 0x3c5   :  { %v576_v38 = vsel %vm575_vm9, %v574_v36, %v570_v37 }
 0x3c6   :  { %948 = vmatmul.msk.f32.vlgmr.msra.gmra.mxu1 %vm181_vm0, %v576_v38 }
 0x3cc   :  { %v847_v42 = vpop.permute.xlu0 %846 }
 0x3ea   :  { %v851_v44 = vpop.permute.xlu2 %850 }
 0x3f9   :  { %v843_v41 = vpop.permute.xlu1 %842 }
 0x3fa   :  { %v853_v43 = vsel %vm299_vm1, %v641_v40, %v843_v41 }
 0x3fb   :  { %v854_v45 = vsel %vm573_vm8, %v853_v43, %v847_v42 }
 0x3fc   :  { %v855_v14 = vsel %vm575_vm9, %v854_v45, %v851_v44 }
 0x3fd   :  { %949 = vmatmul.msk.f32.gmra.mxu1 %vm181_vm0, %v855_v14 }
 0x443   :  { %v887_v47 = vpop.f32.mrf.mxu1 }
 0x444   :  { %v888_v48 = vadd.f32 %v973_v46, %v887_v47 }
 0x446   :  { %893 = vst.msk [vmem:[#allocation16] sm:$0xff] %vm181_vm0, %v888_v48 }
 0x47a   :  { %v890_v49 = vpop.f32.mrf.mxu1 }
 0x47b   :  { %v891_v50 = vadd.f32 %v973_v46, %v890_v49 }
 0x47d   :  { %894 = vst.msk [vmem:[#allocation16 + $0x8] sm:$0xff] %vm181_vm0, %v891_v50 }
 0x47e   :  { %907 = dma.vmem_to_hbm [thread:$0]  %s900_s28, 256, %s902_s14, [#allocation4], %s1235_s29, %s1235_s29, %s1236_s30  }
 0x47f   :  { %1232 = dma.done.wait [#allocation4], 256  }
 0x480   :  { %1233 = vsyncadd [#allocation4], 4294967040 }
 0x481   :  { %912 = vsyncpa [#allocation3], 1 }
 0x482   :  { %913 = vsyncpa [#allocation6], 1 }
 0x483   :  { %914 = vsyncpa [#allocation9], 1 }
 0x484   :  { %915 = vsyncpa [#allocation12], 1 }
 0x485   :  { %916 = vsyncpa [#allocation15], 1 }
 0x486   :  { %917 = vsyncpa [#allocation4], 1 }

</bundles_post_ra>
